<compile_context>
chip_gen: v7x
topology: tpu7x:2x2x1
jax: 0.10.0
libtpu: 0.0.40
codegen_flags: <defaults>
</compile_context>

<pallas_src>
import math

import jax
import jax.numpy as jnp
from jax.experimental import pallas as pl
from jax.experimental.pallas import tpu as pltpu


def _feature_selector_kernel(x_ref, gate_ref, out_ref):
    # Pure broadcast-multiply stream: (tr, tc) * (1, tc).  Math in f32 (free VPU
    # filler while HBM-bound), single cast on store.
    x = x_ref[...].astype(jnp.float32)
    out_ref[...] = (x * gate_ref[...]).astype(out_ref.dtype)


def _tpu_vmem_capacity_bytes():
    try:
        return int(pltpu.get_tpu_info().vmem_capacity_bytes)
    except Exception:
        return 64 << 20  # conservative (v7x-sized) fallback


def _choose_fold(B, D, itemsize, block_budget):
    """Lane-folding factor: reshape (B, D) -> (B // fold, fold * D).

    Only folds that divide B exactly are used, so the reshape is a free view of
    the contiguous row-major buffer (never a copy, never a pad)."""
    if D % 128 == 0:
        base = 1
    else:
        base = 128 // math.gcd(D, 128)      # smallest fold with fold*D % 128 == 0
    if base > 1 and B % base != 0:
        return 1                            # no free fold -> stream un-folded
    fold = base
    # Grow toward a lane-dense (>=512) minor dim while the reshape stays free.
    while (fold * D < 512 and B % (fold * 2) == 0
           and fold * 2 * D * itemsize <= block_budget):
        fold *= 2
    return fold


def feature_selector(prev_x, mu, noise, *, sigma, training=True,
                     target_block_bytes=None, force_pallas=False):
    """prev_x: (B, D); mu, noise: (D,).

    Returns prev_x * hard_sigmoid(mu + sigma * noise * training) in prev_x's
    dtype (multiply performed in f32, cast once on store)."""
    B, D = prev_x.shape
    out_dtype = prev_x.dtype
    itemsize = jnp.dtype(out_dtype).itemsize

    # ---- gate precompute: O(D) wrapper work, removes a per-tile input stream.
    # TODO(synk): PyTorch resamples noise in-place (noise.normal_()) each forward;
    # here the caller supplies `noise` explicitly (functional translation).
    mu_f32 = mu.reshape(-1).astype(jnp.float32)
    z = mu_f32
    if training:
        z = z + jnp.float32(sigma) * noise.reshape(-1).astype(jnp.float32)
    gate = jnp.clip(z + 0.5, 0.0, 1.0)                      # (D,) f32

    # ---- tiny / degenerate problems: a fused XLA elementwise op beats the
    # pallas_call launch overhead (and avoids single-block grids on v7x).
    if B == 0 or D == 0 or (not force_pallas and B * D * itemsize < (4 << 20)):
        return (prev_x.astype(jnp.float32) * gate[None, :]).astype(out_dtype)

    # ---- generation-aware block sizing.
    vmem_cap = _tpu_vmem_capacity_bytes()
    vmem_limit = min(32 << 20, vmem_cap // 2)   # 32 MiB: legal on v5e/v6e/v7x
    if target_block_bytes is None:
        target_block_bytes = 4 << 20            # 2x(4+4) MiB double-buffered
    # Keep the double-buffered (x + out) working set under the scoped-VMEM limit.
    block_budget = min(target_block_bytes,
                       max(1 << 20, (vmem_limit - (2 << 20)) // 4))

    # ---- lane folding (free reshape only) -> minor dim C, rows_total rows.
    fold = _choose_fold(B, D, itemsize, block_budget)
    C = fold * D
    rows_total = B // fold
    xf = prev_x.reshape(rows_total, C) if fold > 1 else prev_x
    gate_row = (jnp.tile(gate, fold) if fold > 1 else gate).reshape(1, C)

    # ---- lane tile: full width when it fits, else a wide multiple of 128 with a
    # non-dividing (masked-edge) lane grid.  Never a narrow 128-lane tile.
    min_rows = 16
    max_lanes = max(512, block_budget // (min_rows * itemsize))
    if C <= max_lanes:
        tc = C                                            # full dim: always legal
    else:
        tc = max(2048, (max_lanes // 128) * 128)
        tc = min(tc, (C // 128) * 128)

    # ---- row tile: fill ~block_budget; cap so >=4 row blocks exist when the
    # batch allows (megacore work for v7x's second TensorCore).
    tr = max(min_rows, block_budget // (tc * itemsize))
    if rows_total >= 4 * min_rows:
        quarter = -(-rows_total // 4)
        tr = min(tr, -(-quarter // min_rows) * min_rows)
    if tr >= rows_total:
        tr = rows_total                                   # full dim: always legal
    else:
        tr = max(min_rows, (tr // min_rows) * min_rows)   # sublane-aligned

    grid = (pl.cdiv(rows_total, tr), pl.cdiv(C, tc))      # non-dividing: no padding

    outf = pl.pallas_call(
        _feature_selector_kernel,
        out_shape=jax.ShapeDtypeStruct((rows_total, C), out_dtype),
        grid_spec=pl.GridSpec(
            grid=grid,
            in_specs=[
                pl.BlockSpec((tr, tc), lambda i, j: (i, j)),   # x tile (lane-dense)
                pl.BlockSpec((1, tc), lambda i, j: (0, j)),    # broadcast gate row
            ],
            out_specs=pl.BlockSpec((tr, tc), lambda i, j: (i, j)),
        ),
        compiler_params=pltpu.CompilerParams(
            dimension_semantics=("parallel", "parallel"),
            vmem_limit_bytes=vmem_limit,
        ),
    )(xf, gate_row)

    return outf.reshape(B, D) if fold > 1 else outf


if __name__ == "__main__":
    key = jax.random.PRNGKey(0)
    k_mu, k_noise, k_x, k_x2 = jax.random.split(key, 4)
    sigma = 0.5

    # --- Case 1: module-sized example (batch=16, input_dim=32), forced through Pallas.
    B1, D1 = 16, 32
    mu1 = 0.01 * jax.random.normal(k_mu, (D1,), dtype=jnp.float32)
    noise1 = jax.random.normal(k_noise, (D1,), dtype=jnp.float32)
    x1 = jax.random.normal(k_x, (B1, D1), dtype=jnp.float32)

    out1 = jax.block_until_ready(
        feature_selector(x1, mu1, noise1, sigma=sigma, training=True, force_pallas=True)
    )
    gate1 = jnp.clip(mu1 + sigma * noise1 + 0.5, 0.0, 1.0)
    assert jnp.allclose(out1, x1 * gate1[None, :], atol=1e-6), "train-mode mismatch"

    out1e = jax.block_until_ready(
        feature_selector(x1, mu1, noise1, sigma=sigma, training=False, force_pallas=True)
    )
    gate1e = jnp.clip(mu1 + 0.5, 0.0, 1.0)
    assert jnp.allclose(out1e, x1 * gate1e[None, :], atol=1e-6), "eval-mode mismatch"

    # --- Case 2: awkward shape (batch=200, input_dim=33) exercising the un-folded
    # path with a non-dividing row grid (no pads, no slices; partial edge block).
    B2, D2 = 200, 33
    mu2 = 0.01 * jax.random.normal(k_mu, (D2,), dtype=jnp.float32)
    noise2 = jax.random.normal(k_noise, (D2,), dtype=jnp.float32)
    x2 = jax.random.normal(k_x2, (B2, D2), dtype=jnp.float32)

    out2 = jax.block_until_ready(
        feature_selector(x2, mu2, noise2, sigma=sigma, training=True, force_pallas=True)
    )
    gate2 = jnp.clip(mu2 + sigma * noise2 + 0.5, 0.0, 1.0)
    assert jnp.allclose(out2, x2 * gate2[None, :], atol=1e-6), "unfolded-path mismatch"

    # --- bf16 streaming path (f32 multiply, single cast on store).
    x2b = x2.astype(jnp.bfloat16)
    out2b = jax.block_until_ready(
        feature_selector(x2b, mu2, noise2, sigma=sigma, training=True, force_pallas=True)
    )
    ref2b = (x2b.astype(jnp.float32) * gate2[None, :]).astype(jnp.bfloat16)
    assert jnp.allclose(out2b.astype(jnp.float32), ref2b.astype(jnp.float32),
                        atol=5e-2, rtol=5e-2), "bf16-path mismatch"

    print("KERNEL_OK")
</pallas_src>

<mosaic_0001>
module attributes {stable_mosaic.version = 11 : i64} {
  func.func @_feature_selector_kernel(%arg0: i32, %arg1: i32, %arg2: memref<1x512xf32, #tpu.memory_space<vmem>>, %arg3: memref<1x512xf32, #tpu.memory_space<vmem>>, %arg4: memref<1x512xf32, #tpu.memory_space<vmem>>) attributes {dimension_semantics = [#tpu.dimension_semantics<parallel>, #tpu.dimension_semantics<parallel>], iteration_bounds = array<i64: 1, 1>, scalar_prefetch = 0 : i64, scratch_operands = 0 : i64, tpu.core_type = #tpu.core_type<tc>, window_params = [{transform_indices = @transform_0, window_bounds = array<i64: 1, 512>}, {transform_indices = @transform_1, window_bounds = array<i64: 1, 512>}, {transform_indices = @transform_2, window_bounds = array<i64: 1, 512>}]} {
    %c0 = arith.constant 0 : index
    %c0_0 = arith.constant 0 : index
    %0 = vector.load %arg2[%c0, %c0_0] : memref<1x512xf32, #tpu.memory_space<vmem>>, vector<1x512xf32>
    %c0_1 = arith.constant 0 : index
    %c0_2 = arith.constant 0 : index
    %1 = vector.load %arg3[%c0_1, %c0_2] : memref<1x512xf32, #tpu.memory_space<vmem>>, vector<1x512xf32>
    %2 = arith.mulf %0, %1 : vector<1x512xf32>
    %c0_3 = arith.constant 0 : index
    %c0_4 = arith.constant 0 : index
    %3 = vector.load %arg4[%c0_3, %c0_4] : memref<1x512xf32, #tpu.memory_space<vmem>>, vector<1x512xf32>
    tpu.vector_store %arg4[%c0_3, %c0_4], %2 {strides = array<i32>} : memref<1x512xf32, #tpu.memory_space<vmem>>, vector<1x512xf32>,
    return
  }
  func.func @transform_0(%arg0: i32, %arg1: i32) -> (i32, i32) {
    %c0_i32 = arith.constant 0 : i32
    return %arg0, %arg1 : i32, i32
  }
  func.func @transform_1(%arg0: i32, %arg1: i32) -> (i32, i32) {
    %c0_i32 = arith.constant 0 : i32
    %c0_i32_0 = arith.constant 0 : i32
    return %c0_i32, %arg1 : i32, i32
  }
  func.func @transform_2(%arg0: i32, %arg1: i32) -> (i32, i32) {
    %c0_i32 = arith.constant 0 : i32
    return %arg0, %arg1 : i32, i32
  }
}

</mosaic_0001>

<bundles_post_ra>
// kernel: tpu_custom_call.1
= control target key start
LH: loop header
LB: loop body
LE: loop exit
PB: predicated region body
PF: predicated region fallthrough
CT: control target
= control target key end

     0   :  { %7 = vsyncpa [#allocation3], 0  ;;  %s189_s0 = inlined_call_operand.hbm [shape: f32[1,512], index: 0, kind: input, shape index: {}]   ;;  %s190_s1 = inlined_call_operand.hbm [shape: f32[1,512], index: 1, kind: input, shape index: {}]   ;;  %s191_s2 = inlined_call_operand.hbm [shape: f32[1,512], index: 2, kind: output, shape index: {}]  }
   0x1   :  { %8 = vsyncpa [#allocation6], 0 }
   0x2   :  { %9 = vsyncpa [#allocation4], 0  ;;  %s135_s9 = smov [#allocation2]   ;;  %s136_s11 = smov [#allocation5]  }
   0x3   :  { %s16_s10 = sshll.u32 %s135_s9, 4  ;;  %s26_s12 = sshll.u32 %s136_s11, 4  ;;  %s17_s10 = int_to_ptr.vmem [resolvable:$true] %s16_s10  ;;  %s27_s12 = int_to_ptr.vmem [resolvable:$true] %s26_s12 }
   0x4   :  { %s63_s15 = scalar_lea.hbm %s189_s0, 64 }
   0x5   :  { %p64_p0 = scmp.ne.s32.totalorder %s189_s0, %s63_s15  ;;  %p67_p1 = scmp.lt.u32.totalorder %s63_s15, %s189_s0 }
   0x7   :  { %p69_p2 = pnand %p67_p1, %p64_p0 }
   0x9   :  { %72 = shalt.err (!%p69_p2)
}
   0xa   :  { %s73_s20 = scalar_lea.vmem %s17_s10, 64  ;;  %p78_p4 = scmp.lt.s32.totalorder %s17_s10, %s17_s10 }
   0xb   :  { %p74_p3 = scmp.ne.s32.totalorder %s17_s10, %s73_s20  ;;  %p79_p5 = scmp.lt.s32.totalorder %s73_s20, %s73_s20 }
   0xd   :  { %p80_p6 = por %p79_p5, %p78_p4 }
   0xf   :  { %p81_p7 = pnand %p80_p6, %p74_p3 }
  0x11   :  { %84 = shalt.err (!%p81_p7)
}
  0x12   :  { %19 = dma.hbm_to_vmem [thread:$0]  %s189_s0, 64, %s17_s10, [#allocation3]  }
  0x13   :  { %s85_s25 = scalar_lea.hbm %s190_s1, 64 }
  0x14   :  { %p86_p8 = scmp.ne.s32.totalorder %s190_s1, %s85_s25  ;;  %p89_p9 = scmp.lt.u32.totalorder %s85_s25, %s190_s1 }
  0x16   :  { %p91_p10 = pnand %p89_p9, %p86_p8 }
  0x18   :  { %94 = shalt.err (!%p91_p10)
}
  0x19   :  { %s95_s30 = scalar_lea.vmem %s27_s12, 64  ;;  %p100_p12 = scmp.lt.s32.totalorder %s27_s12, %s27_s12 }
  0x1a   :  { %p96_p11 = scmp.ne.s32.totalorder %s27_s12, %s95_s30  ;;  %p101_p13 = scmp.lt.s32.totalorder %s95_s30, %s95_s30 }
  0x1c   :  { %p102_p0 = por %p101_p13, %p100_p12 }
  0x1e   :  { %p103_p1 = pnand %p102_p0, %p96_p11 }
  0x20   :  { %106 = shalt.err (!%p103_p1)
}
  0x21   :  { %29 = dma.hbm_to_vmem [thread:$0]  %s190_s1, 64, %s27_s12, [#allocation6]  }
  0x22   :  { %129 = dma.done.wait [#allocation3], 64  }
  0x23   :  { %130 = vsyncadd [#allocation3], 4294967232 }
  0x24   :  { %131 = dma.done.wait [#allocation6], 64  }
  0x25   :  { %132 = vsyncadd [#allocation6], 4294967232  ;;  %v39_v0 = vlaneseq  ;;  %s137_s4 = smov [#allocation7]   ;;  %v36_v1 = vld [vmem:[#allocation2] sm:$0xf] }
  0x26   :  { %s50_s5 = sshll.u32 %s137_s4, 4  ;;  %v37_v2 = vld [vmem:[#allocation5] sm:$0xf]  ;;  %s51_s5 = int_to_ptr.vmem [resolvable:$true] %s50_s5 }
  0x27   :  { %vm41_vm0 = vcmp.lt.s32.totalorder %v39_v0, 512  ;;  %v38_v3 = vmul.f32 %v37_v2, %v36_v1  ;;  %s107_s6 = scalar_lea.vmem %s51_s5, 64  ;;  %p112_p3 = scmp.lt.s32.totalorder %s51_s5, %s51_s5 }
  0x28   :  { %p108_p2 = scmp.ne.s32.totalorder %s51_s5, %s107_s6  ;;  %p113_p4 = scmp.lt.s32.totalorder %s107_s6, %s107_s6 }
  0x29   :  { %43 = vst.msk [vmem:[#allocation7] sm:$0xf] %vm41_vm0, %v38_v3 }
  0x2a   :  { %p114_p5 = por %p113_p4, %p112_p3 }
  0x2c   :  { %p115_p6 = pnand %p114_p5, %p108_p2 }
  0x2e   :  { %118 = shalt.err (!%p115_p6)
}
  0x2f   :  { %s119_s8 = scalar_lea.hbm %s191_s2, 64 }
  0x30   :  { %p120_p7 = scmp.ne.s32.totalorder %s191_s2, %s119_s8  ;;  %p123_p8 = scmp.lt.u32.totalorder %s119_s8, %s191_s2 }
  0x32   :  { %p125_p9 = pnand %p123_p8, %p120_p7 }
  0x34   :  { %128 = shalt.err (!%p125_p9)
}
  0x35   :  { %53 = dma.vmem_to_hbm [thread:$0]  %s51_s5, 64, %s191_s2, [#allocation4]  }
  0x36   :  { %133 = dma.done.wait [#allocation4], 64  }
  0x37   :  { %134 = vsyncadd [#allocation4], 4294967232 }
  0x38   :  { %57 = vsyncpa [#allocation3], 1 }
  0x39   :  { %58 = vsyncpa [#allocation6], 1 }
  0x3a   :  { %59 = vsyncpa [#allocation4], 1 }

</bundles_post_ra>
